<compile_context>
chip_gen: v7x
topology: tpu7x:2x2x1
jax: 0.10.0
libtpu: 0.0.40
codegen_flags: <defaults>
</compile_context>

<pallas_src>
import functools

import jax
import jax.numpy as jnp
from jax.experimental import pallas as pl
from jax.experimental.pallas import tpu as pltpu


def _mlp_kernel(x_ref, w1_ref, b1_ref, w2_ref, b2_ref, w3_ref, b3_ref, o_ref,
                *, use_bf16):
    # x_ref: (6, tb) activation tile, batch on lanes.
    prec = None if use_bf16 else jax.lax.Precision.HIGHEST
    xt = x_ref[...]
    if use_bf16:
        xt = xt.astype(jnp.bfloat16)          # VPU cast, hidden under MXU

    # fc1 + ReLU : (64, 6) @ (6, tb) -> (64, tb)
    h1 = jnp.dot(w1_ref[...], xt, preferred_element_type=jnp.float32, precision=prec)
    h1 = jnp.maximum(h1 + b1_ref[...], 0.0)
    if use_bf16:
        h1 = h1.astype(jnp.bfloat16)          # 16 K-rows per pushed vreg in layer 2

    # fc2 + ReLU : (32, 64) @ (64, tb) -> (32, tb)
    h2 = jnp.dot(w2_ref[...], h1, preferred_element_type=jnp.float32, precision=prec)
    h2 = jnp.maximum(h2 + b2_ref[...], 0.0)
    if use_bf16:
        h2 = h2.astype(jnp.bfloat16)

    # fc3 + Sigmoid : (1, 32) @ (32, tb) -> (1, tb)   (lane-dense output tile)
    logits = jnp.dot(w3_ref[...], h2, preferred_element_type=jnp.float32, precision=prec)
    o_ref[...] = jax.nn.sigmoid(logits + b3_ref[...])   # exp on EUP, no VALU divide


def _choose_tile(batch, tb_max):
    """Pick a 128-multiple tile so tiles divide the batch roughly evenly."""
    lanes = pl.cdiv(batch, 128) * 128          # valid work rounded to one vreg column
    n_tiles = pl.cdiv(lanes, tb_max)
    if n_tiles == 1 and lanes >= 4096:
        n_tiles = 2                            # give v7x's second TensorCore work
    elif n_tiles > 1 and n_tiles % 2:
        n_tiles += 1                           # even split across 2 TCs
    return pl.cdiv(pl.cdiv(lanes, n_tiles), 128) * 128


def maintenance_model_forward(x, params, *, tb=16384, use_bf16=False,
                              vmem_limit_bytes=None):
    """x: (B, 6) float32 -> (B, 1) float32. All compute in one Pallas kernel."""
    w1, b1, w2, b2, w3, b3 = params
    B = x.shape[0]
    tb = _choose_tile(B, int(tb))
    grid = (pl.cdiv(B, tb),)                   # last block may be partial (no pad-to-tb)

    # Batch-on-lanes view; no zero-init, no pad, no scatter-set.
    xt = x.astype(jnp.float32).T               # (6, B)
    if use_bf16:
        w1, w2, w3 = (w.astype(jnp.bfloat16) for w in (w1, w2, w3))

    param_bytes = sum(int(p.size) * p.dtype.itemsize for p in (w1, b1, w2, b2, w3, b3))
    cost = pl.CostEstimate(
        flops=2 * B * (6 * 64 + 64 * 32 + 32 * 1),
        transcendentals=B,
        bytes_accessed=B * (6 * 4 + 4) + param_bytes,
    )

    resident = lambda p: pl.BlockSpec(p.shape, lambda i: (0, 0))  # fetched once, stays in VMEM

    out_t = pl.pallas_call(
        functools.partial(_mlp_kernel, use_bf16=use_bf16),
        out_shape=jax.ShapeDtypeStruct((1, B), jnp.float32),
        grid=grid,
        in_specs=[
            pl.BlockSpec((6, tb), lambda i: (0, i)),   # x stream: default double-buffering
            resident(w1), resident(b1),
            resident(w2), resident(b2),
            resident(w3), resident(b3),
        ],
        out_specs=pl.BlockSpec((1, tb), lambda i: (0, i)),  # lane-dense output tile
        compiler_params=pltpu.CompilerParams(
            dimension_semantics=("parallel",),   # megacore sharding on v7x
            vmem_limit_bytes=vmem_limit_bytes,   # only needed if tb >= ~32768
        ),
        cost_estimate=cost,
    )(xt, w1, b1, w2, b2, w3, b3)

    return out_t.reshape(B, 1)


def init_params(key):
    """PyTorch nn.Linear default init, stored in (out, in) / (out, 1) layout."""
    def linear(key, fan_in, fan_out):
        kw, kb = jax.random.split(key)
        bound = 1.0 / jnp.sqrt(float(fan_in))
        w = jax.random.uniform(kw, (fan_out, fan_in), jnp.float32, -bound, bound)
        b = jax.random.uniform(kb, (fan_out, 1), jnp.float32, -bound, bound)
        return w, b

    k1, k2, k3 = jax.random.split(key, 3)
    w1, b1 = linear(k1, 6, 64)
    w2, b2 = linear(k2, 64, 32)
    w3, b3 = linear(k3, 32, 1)
    return (w1, b1, w2, b2, w3, b3)


def _reference_forward(x, params):
    """Strict-f32 golden (precision pinned so it matches a true f32 forward)."""
    hi = jax.lax.Precision.HIGHEST
    w1, b1, w2, b2, w3, b3 = params
    h1 = jnp.maximum(jnp.dot(x, w1.T, precision=hi) + b1[:, 0], 0.0)
    h2 = jnp.maximum(jnp.dot(h1, w2.T, precision=hi) + b2[:, 0], 0.0)
    return jax.nn.sigmoid(jnp.dot(h2, w3.T, precision=hi) + b3[:, 0])


if __name__ == "__main__":
    key = jax.random.PRNGKey(0)
    k_in1, k_in2, k_par = jax.random.split(key, 3)
    params = init_params(k_par)

    # Small batch: single (partial) tile, strict-f32 path.
    batch = 8
    x = jax.random.normal(k_in1, (batch, 6), dtype=jnp.float32)
    out = jax.block_until_ready(maintenance_model_forward(x, params))
    ref = _reference_forward(x, params)
    assert out.shape == (batch, 1)
    assert jnp.allclose(out, ref, atol=1e-5, rtol=1e-5)

    # Ragged batch exercising a multi-step grid + partial final block (no pad-to-tb).
    batch2 = 300
    x2 = jax.random.normal(k_in2, (batch2, 6), dtype=jnp.float32)
    out2 = jax.block_until_ready(maintenance_model_forward(x2, params, tb=128))
    ref2 = _reference_forward(x2, params)
    assert out2.shape == (batch2, 1)
    assert jnp.allclose(out2, ref2, atol=1e-5, rtol=1e-5)

    # bf16 fast path (~3-5x fewer MXU pushes) with a correspondingly relaxed tolerance.
    out3 = jax.block_until_ready(
        maintenance_model_forward(x2, params, tb=128, use_bf16=True))
    assert out3.shape == (batch2, 1)
    assert jnp.allclose(out3, ref2, atol=2e-2, rtol=2e-2)

    print("KERNEL_OK")
</pallas_src>

<mosaic_0001>
module attributes {stable_mosaic.version = 11 : i64} {
  func.func @_mlp_kernel(%arg0: i32, %arg1: memref<6x128xf32, #tpu.memory_space<vmem>>, %arg2: memref<64x6xf32, #tpu.memory_space<vmem>>, %arg3: memref<64x1xf32, #tpu.memory_space<vmem>>, %arg4: memref<32x64xf32, #tpu.memory_space<vmem>>, %arg5: memref<32x1xf32, #tpu.memory_space<vmem>>, %arg6: memref<1x32xf32, #tpu.memory_space<vmem>>, %arg7: memref<1x1xf32, #tpu.memory_space<vmem>>, %arg8: memref<1x128xf32, #tpu.memory_space<vmem>>) attributes {dimension_semantics = [#tpu.dimension_semantics<parallel>], iteration_bounds = array<i64: 1>, scalar_prefetch = 0 : i64, scratch_operands = 0 : i64, tpu.core_type = #tpu.core_type<tc>, window_params = [{transform_indices = @transform_0, window_bounds = array<i64: 6, 128>}, {pipeline_mode = #tpu.pipeline_mode<synchronous>, transform_indices = @transform_1, window_bounds = array<i64: 64, 6>}, {pipeline_mode = #tpu.pipeline_mode<synchronous>, transform_indices = @transform_2, window_bounds = array<i64: 64, 1>}, {pipeline_mode = #tpu.pipeline_mode<synchronous>, transform_indices = @transform_3, window_bounds = array<i64: 32, 64>}, {pipeline_mode = #tpu.pipeline_mode<synchronous>, transform_indices = @transform_4, window_bounds = array<i64: 32, 1>}, {pipeline_mode = #tpu.pipeline_mode<synchronous>, transform_indices = @transform_5, window_bounds = array<i64: 1, 32>}, {pipeline_mode = #tpu.pipeline_mode<synchronous>, transform_indices = @transform_6, window_bounds = array<i64: 1, 1>}, {transform_indices = @transform_7, window_bounds = array<i64: 1, 128>}]} {
    %c0 = arith.constant 0 : index
    %c0_0 = arith.constant 0 : index
    %0 = vector.load %arg1[%c0, %c0_0] : memref<6x128xf32, #tpu.memory_space<vmem>>, vector<6x128xf32>
    %c0_1 = arith.constant 0 : index
    %c0_2 = arith.constant 0 : index
    %1 = vector.load %arg2[%c0_1, %c0_2] : memref<64x6xf32, #tpu.memory_space<vmem>>, vector<64x6xf32>
    %cst = arith.constant dense<0.000000e+00> : vector<64x128xf32>
    %2 = tpu.matmul %1, %0, %cst {dimension_numbers = #tpu.dot_dimension_numbers<[1], [0], [0], [1], [0, 0, 1, 1], [], []>, precision = #tpu.contract_precision<fp32>} : vector<64x6xf32>, vector<6x128xf32>, vector<64x128xf32> -> vector<64x128xf32>
    %c0_3 = arith.constant 0 : index
    %c0_4 = arith.constant 0 : index
    %3 = vector.load %arg3[%c0_3, %c0_4] : memref<64x1xf32, #tpu.memory_space<vmem>>, vector<64x1xf32>
    %4 = vector.broadcast %3 : vector<64x1xf32> to vector<64x128xf32>
    %5 = arith.addf %2, %4 : vector<64x128xf32>
    %cst_5 = arith.constant 0.000000e+00 : f32
    %6 = vector.broadcast %cst_5 : f32 to vector<64x128xf32>
    %7 = arith.maximumf %5, %6 : vector<64x128xf32>
    %c0_6 = arith.constant 0 : index
    %c0_7 = arith.constant 0 : index
    %8 = vector.load %arg4[%c0_6, %c0_7] : memref<32x64xf32, #tpu.memory_space<vmem>>, vector<32x64xf32>
    %cst_8 = arith.constant dense<0.000000e+00> : vector<32x128xf32>
    %9 = tpu.matmul %8, %7, %cst_8 {dimension_numbers = #tpu.dot_dimension_numbers<[1], [0], [0], [1], [0, 0, 1, 1], [], []>, precision = #tpu.contract_precision<fp32>} : vector<32x64xf32>, vector<64x128xf32>, vector<32x128xf32> -> vector<32x128xf32>
    %c0_9 = arith.constant 0 : index
    %c0_10 = arith.constant 0 : index
    %10 = vector.load %arg5[%c0_9, %c0_10] : memref<32x1xf32, #tpu.memory_space<vmem>>, vector<32x1xf32>
    %11 = vector.broadcast %10 : vector<32x1xf32> to vector<32x128xf32>
    %12 = arith.addf %9, %11 : vector<32x128xf32>
    %cst_11 = arith.constant 0.000000e+00 : f32
    %13 = vector.broadcast %cst_11 : f32 to vector<32x128xf32>
    %14 = arith.maximumf %12, %13 : vector<32x128xf32>
    %c0_12 = arith.constant 0 : index
    %c0_13 = arith.constant 0 : index
    %15 = vector.load %arg6[%c0_12, %c0_13] : memref<1x32xf32, #tpu.memory_space<vmem>>, vector<1x32xf32>
    %cst_14 = arith.constant dense<0.000000e+00> : vector<1x128xf32>
    %16 = tpu.matmul %15, %14, %cst_14 {dimension_numbers = #tpu.dot_dimension_numbers<[1], [0], [0], [1], [0, 0, 1, 1], [], []>, precision = #tpu.contract_precision<fp32>} : vector<1x32xf32>, vector<32x128xf32>, vector<1x128xf32> -> vector<1x128xf32>
    %c0_15 = arith.constant 0 : index
    %c0_16 = arith.constant 0 : index
    %17 = vector.load %arg7[%c0_15, %c0_16] : memref<1x1xf32, #tpu.memory_space<vmem>>, vector<1x1xf32>
    %18 = vector.broadcast %17 : vector<1x1xf32> to vector<1x128xf32>
    %19 = arith.addf %16, %18 : vector<1x128xf32>
    %20 = arith.negf %19 : vector<1x128xf32>
    %21 = math.exp %20 : vector<1x128xf32>
    %cst_17 = arith.constant 1.000000e+00 : f32
    %22 = vector.broadcast %cst_17 : f32 to vector<1x128xf32>
    %23 = arith.addf %22, %21 : vector<1x128xf32>
    %24 = arith.divf %22, %23 : vector<1x128xf32>
    %c0_18 = arith.constant 0 : index
    %c0_19 = arith.constant 0 : index
    %25 = vector.load %arg8[%c0_18, %c0_19] : memref<1x128xf32, #tpu.memory_space<vmem>>, vector<1x128xf32>
    tpu.vector_store %arg8[%c0_18, %c0_19], %24 {strides = array<i32>} : memref<1x128xf32, #tpu.memory_space<vmem>>, vector<1x128xf32>,
    return
  }
  func.func @transform_0(%arg0: i32) -> (i32, i32) {
    %c0_i32 = arith.constant 0 : i32
    %c0_i32_0 = arith.constant 0 : i32
    return %c0_i32, %arg0 : i32, i32
  }
  func.func @transform_1(%arg0: i32) -> (i32, i32) {
    %c0_i32 = arith.constant 0 : i32
    %c0_i32_0 = arith.constant 0 : i32
    %c0_i32_1 = arith.constant 0 : i32
    return %c0_i32, %c0_i32_0 : i32, i32
  }
  func.func @transform_2(%arg0: i32) -> (i32, i32) {
    %c0_i32 = arith.constant 0 : i32
    %c0_i32_0 = arith.constant 0 : i32
    %c0_i32_1 = arith.constant 0 : i32
    return %c0_i32, %c0_i32_0 : i32, i32
  }
  func.func @transform_3(%arg0: i32) -> (i32, i32) {
    %c0_i32 = arith.constant 0 : i32
    %c0_i32_0 = arith.constant 0 : i32
    %c0_i32_1 = arith.constant 0 : i32
    return %c0_i32, %c0_i32_0 : i32, i32
  }
  func.func @transform_4(%arg0: i32) -> (i32, i32) {
    %c0_i32 = arith.constant 0 : i32
    %c0_i32_0 = arith.constant 0 : i32
    %c0_i32_1 = arith.constant 0 : i32
    return %c0_i32, %c0_i32_0 : i32, i32
  }
  func.func @transform_5(%arg0: i32) -> (i32, i32) {
    %c0_i32 = arith.constant 0 : i32
    %c0_i32_0 = arith.constant 0 : i32
    %c0_i32_1 = arith.constant 0 : i32
    return %c0_i32, %c0_i32_0 : i32, i32
  }
  func.func @transform_6(%arg0: i32) -> (i32, i32) {
    %c0_i32 = arith.constant 0 : i32
    %c0_i32_0 = arith.constant 0 : i32
    %c0_i32_1 = arith.constant 0 : i32
    return %c0_i32, %c0_i32_0 : i32, i32
  }
  func.func @transform_7(%arg0: i32) -> (i32, i32) {
    %c0_i32 = arith.constant 0 : i32
    %c0_i32_0 = arith.constant 0 : i32
    return %c0_i32, %arg0 : i32, i32
  }
}

</mosaic_0001>

<bundles_post_ra>
// kernel: tpu_custom_call.1
= control target key start
LH: loop header
LB: loop body
LE: loop exit
PB: predicated region body
PF: predicated region fallthrough
CT: control target
= control target key end

     0   :  { %s3219_s0 = inlined_call_operand.vmem [shape: f32[6,8], index: 0, kind: input, shape index: {}]   ;;  %s3220_s1 = inlined_call_operand.vmem [shape: f32[64,6], index: 1, kind: input, shape index: {}]   ;;  %s3221_s2 = inlined_call_operand.vmem [shape: f32[64,1], index: 2, kind: input, shape index: {}]   ;;  %s3222_s3 = inlined_call_operand.vmem [shape: f32[32,64], index: 3, kind: input, shape index: {}]   ;;  %s3223_s4 = inlined_call_operand.vmem [shape: f32[32,1], index: 4, kind: input, shape index: {}]   ;;  %s3224_s5 = inlined_call_operand.vmem [shape: f32[1,32], index: 5, kind: input, shape index: {}]   ;;  %s3225_s6 = inlined_call_operand.<no memory space> [shape: f32[1,1], index: 6, kind: input, shape index: {}]   ;;  %s3226_s7 = inlined_call_operand.hbm [shape: f32[1,8], index: 7, kind: output, shape index: {}]  }
   0x1   :  { %v12_v0 = vstv %s3225_s6 }
   0x2   :  { %13 = vst [vmem:[#allocation2] sm:$0x1] %v12_v0 }
   0x3   :  { %v29_v1 = vld [vmem:[%s3219_s0] sm:$0x3f]  ;;  %vm111_vm0 = vcmask 1045504   ;;  %vm86_vm1 = vcmask 48128   ;;  %v31_v3 = vld [vmem:[%s3220_s1 + $0x8] sm:$0xff]  ;;  %v32_v6 = vld [vmem:[%s3220_s1 + $0x10] sm:$0xff] }
   0x4   :  { %v30_v2 = vld [vmem:[%s3220_s1] sm:$0xff]  ;;  %v113_v4 = vsel %vm111_vm0, %v29_v1, 0  ;;  %v33_v7 = vld [vmem:[%s3220_s1 + $0x18] sm:$0xff]  ;;  %v91_v10 = vsel %vm86_vm1, %v31_v3, 0  ;;  %v94_v11 = vsel %vm86_vm1, %v32_v6, 0  ;;  %v35_v18 = vld [vmem:[%s3220_s1 + $0x28] sm:$0xff] }
   0x5   :  { %v88_v5 = vsel %vm86_vm1, %v30_v2, 0  ;;  %v2854_v8 = vand.u32 4294901760, %v113_v4  ;;  %v34_v12 = vld [vmem:[%s3220_s1 + $0x20] sm:$0xff]  ;;  %v97_v14 = vsel %vm86_vm1, %v33_v7, 0  ;;  %v2867_v15 = vand.u32 4294901760, %v91_v10  ;;  %v36_v20 = vld [vmem:[%s3220_s1 + $0x30] sm:$0xff] }
   0x6   :  { %v2856_v9 = vand.u32 4294901760, %v88_v5  ;;  %v2869_v16 = vand.u32 4294901760, %v94_v11  ;;  %v100_v17 = vsel %vm86_vm1, %v34_v12, 0  ;;  %v2887_v23 = vand.u32 4294901760, %v97_v14 }
   0x7   :  { %v263_v13 = vsub.f32 %v113_v4, %v2854_v8  ;;  %2259 = vmatprep.subr.mxu1 %v2854_v8  ;;  %v2885_v22 = vsub.f32 %v91_v10, %v2867_v15  ;;  %v2893_v26 = vand.u32 4294901760, %v100_v17  ;;  %v103_v27 = vsel %vm86_vm1, %v35_v18, 0 }
   0x8   :  { %2275 = vmatprep.mubr.f32.mxu0 %v2856_v9  ;;  %2260 = vmatpush3.msra.mxu1 %v2854_v8  ;;  %v2882_v21 = vsub.f32 %v88_v5, %v2856_v9  ;;  %v2890_v24 = vsub.f32 %v94_v11, %v2869_v16 }
   0x9   :  { %v2876_v19 = vand.u32 4294901760, %v263_v13 }
   0xa   :  { %v183_v28 = vand.u32 4294901760, %v2882_v21 }
   0xb   :  { %v265_v25 = vsub.f32 %v263_v13, %v2876_v19 }
   0xc   :  { %14 = vsyncpa [#allocation4], 0  ;;  %v106_v29 = vsel %vm86_vm1, %v36_v20, 0  ;;  %v37_v30 = vld [vmem:[%s3220_s1 + $0x38] sm:$0xff]  ;;  %v2902_v31 = vsub.f32 %v97_v14, %v2887_v23  ;;  %v193_v32 = vand.u32 4294901760, %v2885_v22  ;;  %v203_v33 = vand.u32 4294901760, %v2890_v24 }
   0xd   :  { %v266_v34 = vand.u32 4294901760, %v265_v25  ;;  %v2907_v35 = vsub.f32 %v100_v17, %v2893_v26  ;;  %v184_v36 = vsub.f32 %v2882_v21, %v183_v28  ;;  %v2912_v37 = vand.u32 4294901760, %v103_v27  ;;  %v38_v54 = vld [vmem:[%s3221_s2] sm:$0xff]  ;;  %v40_v61 = vld [vmem:[%s3221_s2 + $0x10] sm:$0xff]  ;;  %v39_v63 = vld [vmem:[%s3221_s2 + $0x8] sm:$0xff] }
   0xe   :  { %v213_v38 = vand.u32 4294901760, %v2902_v31  ;;  %v194_v39 = vsub.f32 %v2885_v22, %v193_v32  ;;  %v204_v40 = vsub.f32 %v2890_v24, %v203_v33  ;;  %v2921_v41 = vand.u32 4294901760, %v106_v29  ;;  %v41_v3 = vld [vmem:[%s3221_s2 + $0x18] sm:$0xff]  ;;  %v42_v4 = vld [vmem:[%s3221_s2 + $0x20] sm:$0xff]  ;;  %v43_v6 = vld [vmem:[%s3221_s2 + $0x28] sm:$0xff] }
   0xf   :  { %2273 = vmatprep.subr.mxu0 %v266_v34  ;;  %v109_v42 = vsel %vm86_vm1, %v37_v30, 0  ;;  %v223_v43 = vand.u32 4294901760, %v2907_v35  ;;  %v185_v44 = vand.u32 4294901760, %v184_v36  ;;  %v2926_v45 = vsub.f32 %v103_v27, %v2912_v37  ;;  %v44_v7 = vld [vmem:[%s3221_s2 + $0x30] sm:$0xff]  ;;  %v45_v10 = vld [vmem:[%s3221_s2 + $0x38] sm:$0xff]  ;;  %v874_v11 = vld [vmem:[%s3223_s4] sm:$0xff] }
  0x10   :  { %2274 = vmatpush3.msra.mxu0 %v266_v34  ;;  %v195_v46 = vand.u32 4294901760, %v194_v39  ;;  %v214_v47 = vsub.f32 %v2902_v31, %v213_v38  ;;  %v2933_v48 = vsub.f32 %v106_v29, %v2921_v41  ;;  %v205_v49 = vand.u32 4294901760, %v204_v40  ;;  %v875_v12 = vld [vmem:[%s3223_s4 + $0x8] sm:$0xff]  ;;  %v877_v14 = vld [vmem:[%s3223_s4 + $0x18] sm:$0xff]  ;;  %v1582_v17 = vld [vmem:[#allocation2] sm:$0x1] }
  0x11   :  { %2276 = vmatmul.mubr.f32.vlgmr.msra.gmra.mrb[0].mxu0 %v2867_v15  ;;  %2287 = vmatprep.subr.mxu0 %v263_v13  ;;  %v224_v50 = vsub.f32 %v2907_v35, %v223_v43  ;;  %v2939_v51 = vand.u32 4294901760, %v109_v42  ;;  %v233_v52 = vand.u32 4294901760, %v2926_v45  ;;  %v2790_v58 = vmov 0   ;;  %v871_v29 = vld [vmem:[%s3222_s3 + $0x8] sm:$0xff]  ;;  %v872_v30 = vld [vmem:[%s3222_s3 + $0x10] sm:$0xff] }
  0x12   :  { %2278 = vmatprep.mubr.f32.mxu0 %v2869_v16  ;;  %2288 = vmatpush3.msra.mxu0 %v263_v13  ;;  %v243_v53 = vand.u32 4294901760, %v2933_v48  ;;  %v215_v56 = vand.u32 4294901760, %v214_v47  ;;  %v876_v13 = vld [vmem:[%s3223_s4 + $0x10] sm:$0xff]  ;;  %vm898_vm2 = vcmask 523264   ;;  %vm2792_vm3 = vmmov 0  }
  0x13   :  { %2301 = vmatprep.subr.mxu0 %v2854_v8  ;;  %2261 = vmatprep.mubr.f32.mxu1 %v185_v44  ;;  %v2948_v55 = vsub.f32 %v109_v42, %v2939_v51  ;;  %v234_v57 = vsub.f32 %v2926_v45, %v233_v52  ;;  %v225_v59 = vand.u32 4294901760, %v224_v50  ;;  %v906_v34 = vsel %vm898_vm2, %v872_v30, 0 }
  0x14   :  { %2262 = vmatmul.mubr.f32.vlgmr.msra.gmra.mrb[0].mxu1 %v195_v46  ;;  %2760 = vset.pattern.permute.xlu0 %v2790_v58  ;;  %v244_v60 = vsub.f32 %v2933_v48, %v243_v53  ;;  %vm1592_vm4 = vcmask 261120  }
  0x15   :  { %2279 = vmatmul.mubr.f32.gmra.mrb[2].mxu0 %v2887_v23  ;;  %2264 = vmatprep.mubr.f32.mxu1 %v205_v49  ;;  %v253_v62 = vand.u32 4294901760, %v2948_v55  ;;  %v235_v0 = vand.u32 4294901760, %v234_v57 }
  0x16   :  { %2281 = vmatprep.mubr.f32.mxu0 %v2893_v26  ;;  %48 = vperm.xlu0 %2760, %v38_v54   ;;  %v245_v2 = vand.u32 4294901760, %v244_v60 }
  0x17   :  { %2761 = vset.pattern.permute.xlu1 %v2790_v58  ;;  %v254_v1 = vsub.f32 %v2948_v55, %v253_v62 }
  0x18   :  { %2265 = vmatmul.mubr.f32.gmra.mrb[2].mxu1 %v215_v56  ;;  %58 = vperm.xlu1 %2761, %v40_v61  }
  0x19   :  { %2282 = vmatmul.mubr.f32.gmra.mrb[4].mxu0 %v2912_v37  ;;  %2267 = vmatprep.mubr.f32.mxu1 %v225_v59  ;;  %v255_v5 = vand.u32 4294901760, %v254_v1 }
  0x1a   :  { %2284 = vmatprep.mubr.f32.mxu0 %v2921_v41  ;;  %53 = vperm.xlu0 %2760, %v39_v63  }
  0x1c   :  { %2268 = vmatmul.mubr.f32.gmra.mrb[4].mxu1 %v235_v0  ;;  %63 = vperm.xlu1 %2761, %v41_v3  }
  0x1d   :  { %2285 = vmatmul.mubr.f32.gmra.mrb[6].mxu0 %v2939_v51  ;;  %2270 = vmatprep.mubr.f32.mxu1 %v245_v2 }
  0x1e   :  { %2289 = vmatprep.mubr.f32.mxu0 %v2882_v21  ;;  %68 = vperm.xlu0 %2760, %v42_v4  }
  0x20   :  { %2271 = vmatmul.mubr.f32.gmra.mrb[6].mxu1 %v255_v5  ;;  %73 = vperm.xlu1 %2761, %v43_v6  }
  0x21   :  { %2290 = vmatmul.mubr.f32.vlgmr.msra.gmra.mrb[0].mxu0 %v2885_v22 }
  0x22   :  { %2292 = vmatprep.mubr.f32.mxu0 %v2890_v24  ;;  %2302 = vmatpush3.msra.mxu0 %v2854_v8 }
  0x23   :  { %2315 = vmatprep.subr.mxu0 %v2876_v19  ;;  %78 = vperm.xlu0 %2760, %v44_v7  }
  0x24   :  { %83 = vperm.xlu1 %2761, %v45_v10  }
  0x25   :  { %2293 = vmatmul.mubr.f32.gmra.mrb[2].mxu0 %v2902_v31 }
  0x26   :  { %2295 = vmatprep.mubr.f32.mxu0 %v2907_v35  ;;  %v873_v35 = vld [vmem:[%s3222_s3 + $0x18] sm:$0xff] }
  0x27   :  { %880 = vperm.xlu0 %2760, %v874_v11  }
  0x28   :  { %885 = vperm.xlu1 %2761, %v875_v12  }
  0x29   :  { %2296 = vmatmul.mubr.f32.gmra.mrb[4].mxu0 %v2926_v45 }
  0x2a   :  { %2298 = vmatprep.mubr.f32.mxu0 %v2933_v48 }
  0x2b   :  { %890 = vperm.xlu0 %2760, %v876_v13  }
  0x2c   :  { %895 = vperm.xlu1 %2761, %v877_v14  }
  0x2d   :  { %2299 = vmatmul.mubr.f32.gmra.mrb[6].mxu0 %v2948_v55 }
  0x2e   :  { %2303 = vmatprep.mubr.f32.mxu0 %v183_v28 }
  0x2f   :  { %1585 = vperm.xlu0 %2760, %v1582_v17  }
  0x31   :  { %2304 = vmatmul.mubr.f32.vlgmr.msra.gmra.mrb[0].mxu0 %v193_v32  ;;  %v903_v32 = vsel %vm898_vm2, %v871_v29, 0 }
  0x32   :  { %2306 = vmatprep.mubr.f32.mxu0 %v203_v33  ;;  %2316 = vmatpush3.msra.mxu0 %v2876_v19  ;;  %v3063_v36 = vand.u32 4294901760, %v903_v32 }
  0x33   :  { %2329 = vmatprep.subr.mxu0 %v2854_v8 }
  0x35   :  { %2307 = vmatmul.mubr.f32.gmra.mrb[2].mxu0 %v213_v38  ;;  %v909_v38 = vsel %vm898_vm2, %v873_v35, 0 }
  0x36   :  { %2309 = vmatprep.mubr.f32.mxu0 %v223_v43  ;;  %v3071_v42 = vand.u32 4294901760, %v909_v38 }
  0x39   :  { %2310 = vmatmul.mubr.f32.gmra.mrb[4].mxu0 %v233_v52  ;;  %v3078_v52 = vsub.f32 %v909_v38, %v3071_v42 }
  0x3a   :  { %2312 = vmatprep.mubr.f32.mxu0 %v243_v53 }
  0x3b   :  { %v1016_v2 = vand.u32 4294901760, %v3078_v52 }
  0x3d   :  { %2313 = vmatmul.mubr.f32.gmra.mrb[6].mxu0 %v253_v62 }
  0x3e   :  { %2317 = vmatprep.mubr.f32.mxu0 %v2856_v9 }
  0x41   :  { %2318 = vmatmul.mubr.f32.vlgmr.msra.gmra.mrb[0].mxu0 %v2867_v15 }
  0x42   :  { %2320 = vmatprep.mubr.f32.mxu0 %v2869_v16  ;;  %2330 = vmatpush3.msra.mxu0 %v2854_v8  ;;  %v870_v8 = vld [vmem:[%s3222_s3] sm:$0xff] }
  0x45   :  { %2321 = vmatmul.mubr.f32.gmra.mrb[2].mxu0 %v2887_v23 }
  0x46   :  { %2323 = vmatprep.mubr.f32.mxu0 %v2893_v26 }
  0x49   :  { %2324 = vmatmul.mubr.f32.gmra.mrb[4].mxu0 %v2912_v37 }
  0x4a   :  { %2326 = vmatprep.mubr.f32.mxu0 %v2921_v41 }
  0x4d   :  { %2327 = vmatmul.mubr.f32.gmra.mrb[6].mxu0 %v2939_v51 }
  0x4e   :  { %2331 = vmatprep.mubr.f32.mxu0 %v2856_v9  ;;  %v900_v9 = vsel %vm898_vm2, %v870_v8, 0 }
  0x51   :  { %2332 = vmatmul.mubr.f32.vlgmr.msra.gmra.mrb[0].mxu0 %v2867_v15  ;;  %v3043_v15 = vand.u32 4294901760, %v900_v9 }
  0x52   :  { %2334 = vmatprep.mubr.f32.mxu0 %v2869_v16 }
  0x53   :  { %v3046_v16 = vsub.f32 %v900_v9, %v3043_v15 }
  0x55   :  { %2335 = vmatmul.mubr.f32.gmra.mrb[2].mxu0 %v2887_v23  ;;  %v986_v18 = vand.u32 4294901760, %v3046_v16 }
  0x56   :  { %2337 = vmatprep.mubr.f32.mxu0 %v2893_v26 }
  0x57   :  { %v987_v19 = vsub.f32 %v3046_v16, %v986_v18 }
  0x59   :  { %2338 = vmatmul.mubr.f32.gmra.mrb[4].mxu0 %v2912_v37  ;;  %v988_v20 = vand.u32 4294901760, %v987_v19  ;;  %v3065_v37 = vand.u32 4294901760, %v906_v34 }
  0x5a   :  { %2340 = vmatprep.mubr.f32.mxu0 %v2921_v41  ;;  %v3069_v41 = vsub.f32 %v903_v32, %v3063_v36 }
  0x5b   :  { %2359 = vmatprep.mubr.f32.mxu1 %v988_v20  ;;  %v3074_v44 = vsub.f32 %v906_v34, %v3065_v37 }
  0x5d   :  { %2341 = vmatmul.mubr.f32.gmra.mrb[6].mxu0 %v2939_v51  ;;  %v996_v51 = vand.u32 4294901760, %v3069_v41  ;;  %v1006_v55 = vand.u32 4294901760, %v3074_v44 }
  0x5f   :  { %v3084_v1 = vsub.f32 %v3069_v41, %v996_v51  ;;  %v3090_v6 = vsub.f32 %v3074_v44, %v1006_v55 }
  0x95   :  { %v49_v33 = vpop.permute.xlu0 %48 }
  0x97   :  { %v59_v31 = vpop.permute.xlu1 %58 }
  0x99   :  { %v54_v40 = vpop.permute.xlu0 %53 }
  0x9b   :  { %v64_v39 = vpop.permute.xlu1 %63 }
  0x9d   :  { %v69_v56 = vpop.permute.xlu0 %68 }
  0x9f   :  { %v74_v49 = vpop.permute.xlu1 %73 }
  0xa3   :  { %v84_v7 = vpop.permute.xlu1 %83 }
  0xe7   :  { %v2263_v21 = vpop.f32.mrb[0].mxu1 }
  0xe8   :  { %v187_v22 = vpop.f32.mrb[1].mxu1  ;;  %v198_v43 = vadd.f32 %v2263_v21, %v54_v40  ;;  %v79_v21 = vpop.permute.xlu0 %78 }
  0xe9   :  { %v188_v45 = vadd.f32 %v187_v22, %v49_v33 }
  0xeb   :  { %v2266_v23 = vpop.f32.mrb[2].mxu1 }
  0xec   :  { %v207_v24 = vpop.f32.mrb[3].mxu1  ;;  %v218_v53 = vadd.f32 %v2266_v23, %v64_v39 }
  0xed   :  { %v208_v57 = vadd.f32 %v207_v24, %v59_v31 }
  0xef   :  { %v2269_v25 = vpop.f32.mrb[4].mxu1 }
  0xf0   :  { %v227_v26 = vpop.f32.mrb[5].mxu1  ;;  %v238_v3 = vadd.f32 %v2269_v25, %v74_v49 }
  0xf1   :  { %v228_v10 = vadd.f32 %v227_v26, %v69_v56 }
  0xf3   :  { %v2272_v27 = vpop.f32.mrb[6].mxu1 }
  0xf4   :  { %v247_v28 = vpop.f32.mrb[7].mxu1  ;;  %v258_v17 = vadd.f32 %v2272_v27, %v84_v7 }
  0xf5   :  { %v248_v29 = vadd.f32 %v247_v28, %v79_v21  ;;  %v998_v21 = vand.u32 4294901760, %v3084_v1 }
 0x124   :  { %v2333_v46 = vpop.f32.mrb[0].mxu0 }
 0x125   :  { %v2674_v47 = vadd.f32 %v2333_v46, %v198_v43  ;;  %v816_v48 = vpop.f32.mrb[1].mxu0 }
 0x126   :  { %v2676_v50 = vadd.f32 %v816_v48, %v188_v45 }
 0x127   :  { %v863_v54 = vmax.f32 %v2674_v47, 0.0 }
 0x128   :  { %v862_v58 = vmax.f32 %v2676_v50, 0.0  ;;  %v2336_v59 = vpop.f32.mrb[2].mxu0 }
 0x129   :  { %v915_v60 = vand.u32 4294901760, %v863_v54  ;;  %v2678_v61 = vadd.f32 %v2336_v59, %v218_v53  ;;  %v828_v62 = vpop.f32.mrb[3].mxu0 }
 0x12a   :  { %v912_v63 = vand.u32 4294901760, %v862_v58  ;;  %v2680_v0 = vadd.f32 %v828_v62, %v208_v57 }
 0x12b   :  { %v1033_v4 = vsub.f32 %v863_v54, %v915_v60  ;;  %v865_v5 = vmax.f32 %v2678_v61, 0.0 }
 0x12c   :  { %v3092_v11 = vpack.c.bf16 %v915_v60, %v912_v63  ;;  %v1026_v12 = vsub.f32 %v862_v58, %v912_v63  ;;  %v864_v13 = vmax.f32 %v2680_v0, 0.0  ;;  %v2339_v14 = vpop.f32.mrb[4].mxu0 }
 0x12d   :  { %v1034_v8 = vand.u32 4294901760, %v1033_v4  ;;  %v921_v9 = vand.u32 4294901760, %v865_v5  ;;  %v2682_v19 = vadd.f32 %v2339_v14, %v238_v3  ;;  %v840_v20 = vpop.f32.mrb[5].mxu0 }
 0x12e   :  { %v1027_v22 = vand.u32 4294901760, %v1026_v12  ;;  %v918_v23 = vand.u32 4294901760, %v864_v13  ;;  %v2684_v24 = vadd.f32 %v840_v20, %v228_v10  ;;  %2542 = vmatprep.subr.bf16.mxu1 %v3092_v11  ;;  %v3095_v25 = vpack.c.bf16 %v1033_v4, %v1026_v12 }
 0x12f   :  { %v1047_v26 = vsub.f32 %v865_v5, %v921_v9  ;;  %v867_v30 = vmax.f32 %v2682_v19, 0.0  ;;  %2544 = vmatpush3.bf16.msra.mxu1 %v3092_v11  ;;  %v1035_v31 = vsub.f32 %v1033_v4, %v1034_v8 }
 0x130   :  { %v3098_v32 = vpack.c.bf16 %v921_v9, %v918_v23  ;;  %v1040_v27 = vsub.f32 %v864_v13, %v918_v23  ;;  %v866_v33 = vmax.f32 %v2684_v24, 0.0  ;;  %v2342_v34 = vpop.f32.mrb[6].mxu0  ;;  %v1028_v35 = vsub.f32 %v1026_v12, %v1027_v22 }
 0x131   :  { %v1048_v38 = vand.u32 4294901760, %v1047_v26  ;;  %v927_v39 = vand.u32 4294901760, %v867_v30  ;;  %v2686_v40 = vadd.f32 %v2342_v34, %v258_v17  ;;  %v852_v43 = vpop.f32.mrb[7].mxu0  ;;  %v1036_v45 = vand.u32 4294901760, %v1035_v31 }
 0x132   :  { %v1041_v46 = vand.u32 4294901760, %v1040_v27  ;;  %v924_v47 = vand.u32 4294901760, %v866_v33  ;;  %v2688_v48 = vadd.f32 %v852_v43, %v248_v29  ;;  %2546 = vmatprep.subr.bf16.mxu1 %v3098_v32  ;;  %v1029_v28 = vand.u32 4294901760, %v1028_v35 }
 0x133   :  { %v1061_v49 = vsub.f32 %v867_v30, %v927_v39  ;;  %v869_v50 = vmax.f32 %v2686_v40, 0.0  ;;  %2548 = vmatpush3.bf16.msra.mxu1 %v3098_v32  ;;  %v1049_v53 = vsub.f32 %v1047_v26, %v1048_v38  ;;  %v2577_v54 = vpack.c.bf16 %v1047_v26, %v1040_v27 }
 0x134   :  { %v3102_v56 = vpack.c.bf16 %v927_v39, %v924_v47  ;;  %v1054_v57 = vsub.f32 %v866_v33, %v924_v47  ;;  %v868_v58 = vmax.f32 %v2688_v48, 0.0  ;;  %v2557_v59 = vpack.c.bf16 %v1036_v45, %v1029_v28 }
 0x135   :  { %v1062_v60 = vand.u32 4294901760, %v1061_v49  ;;  %v933_v61 = vand.u32 4294901760, %v869_v50  ;;  %v1042_v62 = vsub.f32 %v1040_v27, %v1041_v46  ;;  %v1050_v63 = vand.u32 4294901760, %v1049_v53 }
 0x136   :  { %v1055_v0 = vand.u32 4294901760, %v1054_v57  ;;  %v930_v3 = vand.u32 4294901760, %v868_v58  ;;  %2550 = vmatprep.subr.bf16.mxu1 %v3102_v56  ;;  %v2581_v4 = vpack.c.bf16 %v1061_v49, %v1054_v57  ;;  %v3105_v5 = vpack.c.bf16 %v1034_v8, %v1027_v22 }
 0x137   :  { %v1075_v7 = vsub.f32 %v869_v50, %v933_v61  ;;  %2552 = vmatpush3.bf16.msra.mxu1 %v3102_v56  ;;  %v1043_v10 = vand.u32 4294901760, %v1042_v62  ;;  %v1063_v12 = vsub.f32 %v1061_v49, %v1062_v60  ;;  %v3108_v13 = vpack.c.bf16 %v1048_v38, %v1041_v46 }
 0x138   :  { %v3110_v14 = vpack.c.bf16 %v933_v61, %v930_v3  ;;  %v1068_v17 = vsub.f32 %v868_v58, %v930_v3  ;;  %v1056_v9 = vsub.f32 %v1054_v57, %v1055_v0  ;;  %v3112_v19 = vpack.c.bf16 %v1062_v60, %v1055_v0 }
 0x139   :  { %v1076_v20 = vand.u32 4294901760, %v1075_v7  ;;  %v2561_v23 = vpack.c.bf16 %v1050_v63, %v1043_v10  ;;  %v1064_v24 = vand.u32 4294901760, %v1063_v12  ;;  %v1017_v29 = vsub.f32 %v3078_v52, %v1016_v2 }
 0x13a   :  { %v1069_v8 = vand.u32 4294901760, %v1068_v17  ;;  %2554 = vmatprep.subr.bf16.mxu1 %v3110_v14  ;;  %v1057_v22 = vand.u32 4294901760, %v1056_v9  ;;  %v2585_v26 = vpack.c.bf16 %v1075_v7, %v1068_v17  ;;  %v1008_v31 = vand.u32 4294901760, %v3090_v6 }
 0x13b   :  { %2556 = vmatpush3.bf16.msra.mxu1 %v3110_v14  ;;  %v1077_v30 = vsub.f32 %v1075_v7, %v1076_v20  ;;  %v1018_v38 = vand.u32 4294901760, %v1017_v29 }
 0x13c   :  { %2558 = vmatprep.subr.bf16.mxu1 %v2557_v59  ;;  %v2565_v27 = vpack.c.bf16 %v1064_v24, %v1057_v22  ;;  %v1070_v33 = vsub.f32 %v1068_v17, %v1069_v8  ;;  %v2617_v1 = vpack.c.bf16 %v1076_v20, %v1069_v8 }
 0x13d   :  { %v1078_v34 = vand.u32 4294901760, %v1077_v30  ;;  %v1588_v30 = vlaneseq }
 0x13e   :  { %2360 = vmatmul.mubr.f32.vlgmr.msra.gmra.mrb[8].mxu1 %v998_v21  ;;  %v1071_v35 = vand.u32 4294901760, %v1070_v33 }
 0x13f   :  { %2560 = vmatpush3.bf16.msra.mxu1 %v2557_v59  ;;  %2362 = vmatprep.mubr.f32.mxu1 %v1008_v31  ;;  %v1589_v31 = vshrl.u32 %v1588_v30, 7 }
 0x140   :  { %2562 = vmatprep.subr.bf16.mxu1 %v2561_v23  ;;  %v2569_v39 = vpack.c.bf16 %v1078_v34, %v1071_v35 }
 0x142   :  { %2363 = vmatmul.mubr.f32.gmra.mrb[10].mxu1 %v1018_v38 }
 0x143   :  { %2564 = vmatpush3.bf16.msra.mxu1 %v2561_v23  ;;  %2381 = vmatprep.mubr.f32.mxu1 %v3043_v15 }
 0x144   :  { %2566 = vmatprep.subr.bf16.mxu1 %v2565_v27 }
 0x147   :  { %2568 = vmatpush3.bf16.msra.mxu1 %v2565_v27  ;;  %v1590_v27 = vsub.s32 0, %v1589_v31 }
 0x148   :  { %2570 = vmatprep.subr.bf16.mxu1 %v2569_v39 }
 0x14b   :  { %2572 = vmatpush3.bf16.msra.mxu1 %v2569_v39 }
 0x14c   :  { %2574 = vmatprep.subr.bf16.mxu1 %v3095_v25 }
 0x14e   :  { %2382 = vmatmul.mubr.f32.vlgmr.msra.gmra.mrb[8].mxu1 %v3063_v36 }
 0x14f   :  { %2576 = vmatpush3.bf16.msra.mxu1 %v3095_v25  ;;  %2384 = vmatprep.mubr.f32.mxu1 %v3065_v37 }
 0x150   :  { %2578 = vmatprep.subr.bf16.mxu1 %v2577_v54 }
 0x152   :  { %2385 = vmatmul.mubr.f32.gmra.mrb[10].mxu1 %v3071_v42 }
 0x153   :  { %2580 = vmatpush3.bf16.msra.mxu1 %v2577_v54  ;;  %2403 = vmatprep.mubr.f32.mxu1 %v3046_v16  ;;  %v2791_v16 = vmov 0.0|0.0  }
 0x154   :  { %2582 = vmatprep.subr.bf16.mxu1 %v2581_v4  ;;  %2643 = vmatprep.subr.bf16.mxu0 %v2791_v16 }
 0x157   :  { %2584 = vmatpush3.bf16.msra.mxu1 %v2581_v4 }
 0x158   :  { %2586 = vmatprep.subr.bf16.mxu1 %v2585_v26 }
 0x15b   :  { %2588 = vmatpush3.bf16.msra.mxu1 %v2585_v26 }
 0x15c   :  { %2590 = vmatprep.subr.bf16.mxu1 %v3092_v11 }
 0x15e   :  { %2404 = vmatmul.mubr.f32.vlgmr.msra.gmra.mrb[8].mxu1 %v3069_v41  ;;  %v886_v41 = vpop.permute.xlu1 %885 }
 0x15f   :  { %2592 = vmatpush3.bf16.msra.mxu1 %v3092_v11  ;;  %2406 = vmatprep.mubr.f32.mxu1 %v3074_v44 }
 0x160   :  { %2594 = vmatprep.subr.bf16.mxu1 %v3098_v32 }
 0x162   :  { %2407 = vmatmul.mubr.f32.gmra.mrb[10].mxu1 %v3078_v52 }
 0x163   :  { %2596 = vmatpush3.bf16.msra.mxu1 %v3098_v32  ;;  %2425 = vmatprep.mubr.f32.mxu1 %v986_v18  ;;  %v1581_v18 = vld [vmem:[%s3224_s5] sm:$0x1]  ;;  %s2794_s5 = smov [#allocation3]  }
 0x164   :  { %2598 = vmatprep.subr.bf16.mxu1 %v3102_v56  ;;  %s2094_s23 = sshll.u32 %s2794_s5, 4  ;;  %s2095_s23 = int_to_ptr.vmem [resolvable:$true] %s2094_s23 }
 0x165   :  { %s2766_s24 = scalar_lea.vmem %s2095_s23, 16  ;;  %s2770_s25 = scalar_lea.vmem %s2095_s23, 32 }
 0x166   :  { %p2767_p0 = scmp.ne.s32.totalorder %s2095_s23, %s2766_s24  ;;  %p2771_p1 = scmp.lt.s32.totalorder %s2095_s23, %s2095_s23 }
 0x167   :  { %2600 = vmatpush3.bf16.msra.mxu1 %v3102_v56  ;;  %p2772_p2 = scmp.lt.s32.totalorder %s2770_s25, %s2766_s24 }
 0x168   :  { %2602 = vmatprep.subr.bf16.mxu1 %v3110_v14 }
 0x169   :  { %p2773_p3 = por %p2772_p2, %p2771_p1 }
 0x16b   :  { %2604 = vmatpush3.bf16.msra.mxu1 %v3110_v14  ;;  %p2774_p4 = pnand %p2773_p3, %p2767_p0 }
 0x16c   :  { %2606 = vmatprep.subr.bf16.mxu1 %v3105_v5 }
 0x16e   :  { %2426 = vmatmul.mubr.f32.vlgmr.msra.gmra.mrb[8].mxu1 %v996_v51 }
 0x16f   :  { %2608 = vmatpush3.bf16.msra.mxu1 %v3105_v5  ;;  %2428 = vmatprep.mubr.f32.mxu1 %v1006_v55 }
 0x170   :  { %2610 = vmatprep.subr.bf16.mxu1 %v3108_v13 }
 0x172   :  { %2429 = vmatmul.mubr.f32.gmra.mrb[10].mxu1 %v1016_v2 }
 0x173   :  { %2612 = vmatpush3.bf16.msra.mxu1 %v3108_v13  ;;  %2447 = vmatprep.mubr.f32.mxu1 %v3043_v15 }
 0x174   :  { %2614 = vmatprep.subr.bf16.mxu1 %v3112_v19 }
 0x177   :  { %2616 = vmatpush3.bf16.msra.mxu1 %v3112_v19 }
 0x178   :  { %2618 = vmatprep.subr.bf16.mxu1 %v2617_v1 }
 0x17b   :  { %2620 = vmatpush3.bf16.msra.mxu1 %v2617_v1 }
 0x17c   :  { %2622 = vmatprep.subr.bf16.mxu1 %v3092_v11 }
 0x17e   :  { %2448 = vmatmul.mubr.f32.vlgmr.msra.gmra.mrb[8].mxu1 %v3063_v36 }
 0x17f   :  { %2624 = vmatpush3.bf16.msra.mxu1 %v3092_v11  ;;  %2450 = vmatprep.mubr.f32.mxu1 %v3065_v37  ;;  %v896_v11 = vpop.permute.xlu1 %895 }
 0x180   :  { %2626 = vmatprep.subr.bf16.mxu1 %v3098_v32 }
 0x182   :  { %2451 = vmatmul.mubr.f32.gmra.mrb[10].mxu1 %v3071_v42 }
 0x183   :  { %2628 = vmatpush3.bf16.msra.mxu1 %v3098_v32  ;;  %2469 = vmatprep.mubr.f32.mxu1 %v3043_v15  ;;  %v2793_v15 = vmov 0.0  }
 0x184   :  { %2630 = vmatprep.subr.bf16.mxu1 %v3102_v56  ;;  %2494 = vmatprep.mubr.msk.f32.mxu0 %vm2792_vm3, %v2793_v15 }
 0x187   :  { %2632 = vmatpush3.bf16.msra.mxu1 %v3102_v56 }
 0x188   :  { %2634 = vmatprep.subr.bf16.mxu1 %v3110_v14 }
 0x18b   :  { %2636 = vmatpush3.bf16.msra.mxu1 %v3110_v14 }
 0x18c   :  { %2637 = vmatprep.subr.bf16.mxu1 %v2791_v16 }
 0x18e   :  { %2470 = vmatmul.mubr.f32.vlgmr.msra.gmra.mrb[8].mxu1 %v3063_v36  ;;  %v1594_v36 = vsel %vm1592_vm4, %v1581_v18, 0 }
 0x18f   :  { %2472 = vmatprep.mubr.f32.mxu1 %v3065_v37  ;;  %v3178_v37 = vand.u32 4294901760, %v1594_v36 }
 0x191   :  { %v3181_v55 = vsub.f32 %v1594_v36, %v3178_v37 }
 0x192   :  { %2473 = vmatmul.mubr.f32.gmra.mrb[10].mxu1 %v3071_v42  ;;  %v881_v42 = vpop.permute.xlu0 %880 }
 0x193   :  { %2483 = vmatprep.mubr.msk.f32.mxu1 %vm2792_vm3, %v2793_v15  ;;  %v1667_v47 = vand.u32 4294901760, %v3181_v55 }
 0x195   :  { %v1668_v59 = vsub.f32 %v3181_v55, %v1667_v47 }
 0x196   :  { %v891_v40 = vpop.permute.xlu0 %890 }
 0x197   :  { %v1669_v13 = vand.u32 4294901760, %v1668_v59 }
 0x19a   :  { %v1586_v33 = vpop.permute.xlu0 %1585 }
 0x19b   :  { %v1591_v1 = vrot.slane %v1586_v33, %v1590_v27 }
 0x261   :  { %v2471_v44 = vpop.f32.mrb[8].mxu1 }
 0x262   :  { %v2689_v51 = vadd.f32 %v2471_v44, %v886_v41  ;;  %v1555_v52 = vpop.f32.mrb[9].mxu1 }
 0x263   :  { %v2690_v2 = vadd.f32 %v1555_v52, %v881_v42 }
 0x264   :  { %v1578_v6 = vmax.f32 %v2689_v51, 0.0 }
 0x265   :  { %v1577_v25 = vmax.f32 %v2690_v2, 0.0  ;;  %v2474_v32 = vpop.f32.mrb[10].mxu1 }
 0x266   :  { %v1600_v43 = vand.u32 4294901760, %v1578_v6  ;;  %v2691_v45 = vadd.f32 %v2474_v32, %v896_v11  ;;  %v1567_v46 = vpop.f32.mrb[11].mxu1 }
 0x267   :  { %v1597_v48 = vand.u32 4294901760, %v1577_v25  ;;  %v2692_v28 = vadd.f32 %v1567_v46, %v891_v40 }
 0x268   :  { %v1684_v49 = vsub.f32 %v1578_v6, %v1600_v43  ;;  %v1580_v50 = vmax.f32 %v2691_v45, 0.0 }
 0x269   :  { %v2638_v53 = vpack.c.bf16 %v1600_v43, %v1597_v48  ;;  %v1677_v54 = vsub.f32 %v1577_v25, %v1597_v48  ;;  %v1579_v56 = vmax.f32 %v2692_v28, 0.0 }
 0x26a   :  { %v1685_v57 = vand.u32 4294901760, %v1684_v49  ;;  %v1606_v58 = vand.u32 4294901760, %v1580_v50 }
 0x26b   :  { %v1678_v60 = vand.u32 4294901760, %v1677_v54  ;;  %v1603_v61 = vand.u32 4294901760, %v1579_v56  ;;  %2639 = vmatpush3.bf16.msra.mxu1 %v2638_v53  ;;  %v2650_v62 = vpack.c.bf16 %v1684_v49, %v1677_v54 }
 0x26c   :  { %v1686_v63 = vsub.f32 %v1684_v49, %v1685_v57  ;;  %v1698_v0 = vsub.f32 %v1580_v50, %v1606_v58  ;;  %2640 = vmatprep.subr.bf16.mxu1 %v2791_v16 }
 0x26d   :  { %v1679_v3 = vsub.f32 %v1677_v54, %v1678_v60  ;;  %v2641_v4 = vpack.c.bf16 %v1606_v58, %v1603_v61  ;;  %v1691_v5 = vsub.f32 %v1579_v56, %v1603_v61  ;;  %v2662_v7 = vpack.c.bf16 %v1685_v57, %v1678_v60 }
 0x26e   :  { %v1687_v10 = vand.u32 4294901760, %v1686_v63  ;;  %v1699_v12 = vand.u32 4294901760, %v1698_v0 }
 0x26f   :  { %v1680_v14 = vand.u32 4294901760, %v1679_v3  ;;  %v1692_v17 = vand.u32 4294901760, %v1691_v5  ;;  %2642 = vmatpush3.bf16.msra.mxu1 %v2641_v4  ;;  %v2653_v9 = vpack.c.bf16 %v1698_v0, %v1691_v5 }
 0x270   :  { %v1700_v19 = vsub.f32 %v1698_v0, %v1699_v12 }
 0x271   :  { %v1693_v20 = vsub.f32 %v1691_v5, %v1692_v17  ;;  %v2644_v21 = vpack.c.bf16 %v1687_v10, %v1680_v14  ;;  %v2665_v23 = vpack.c.bf16 %v1699_v12, %v1692_v17 }
 0x272   :  { %v1701_v24 = vand.u32 4294901760, %v1700_v19  ;;  %2484 = vmatmul.mubr.f32.vlgmr.msra.gmra.mrb[12].mxu1 %v1669_v13 }
 0x273   :  { %v1694_v8 = vand.u32 4294901760, %v1693_v20  ;;  %2645 = vmatpush3.bf16.msra.mxu0 %v2644_v21 }
 0x274   :  { %2646 = vmatprep.subr.bf16.mxu0 %v2791_v16 }
 0x275   :  { %v2647_v22 = vpack.c.bf16 %v1701_v24, %v1694_v8 }
 0x277   :  { %2648 = vmatpush3.bf16.msra.mxu0 %v2647_v22 }
 0x278   :  { %2649 = vmatprep.subr.bf16.mxu0 %v2791_v16 }
 0x27a   :  { %2495 = vmatmul.mubr.f32.vlgmr.msra.gmra.mrb[8].mxu0 %v3178_v37 }
 0x27b   :  { %2651 = vmatpush3.bf16.msra.mxu0 %v2650_v62  ;;  %2505 = vmatprep.mubr.msk.f32.mxu0 %vm2792_vm3, %v2793_v15 }
 0x27c   :  { %2652 = vmatprep.subr.bf16.mxu0 %v2791_v16 }
 0x27f   :  { %2654 = vmatpush3.bf16.msra.mxu0 %v2653_v9 }
 0x280   :  { %2655 = vmatprep.subr.bf16.mxu0 %v2791_v16 }
 0x282   :  { %2506 = vmatmul.mubr.f32.vlgmr.msra.gmra.mrb[8].mxu0 %v3181_v55 }
 0x283   :  { %2657 = vmatpush3.bf16.msra.mxu0 %v2638_v53  ;;  %2516 = vmatprep.mubr.msk.f32.mxu0 %vm2792_vm3, %v2793_v15 }
 0x284   :  { %2658 = vmatprep.subr.bf16.mxu0 %v2791_v16 }
 0x287   :  { %2660 = vmatpush3.bf16.msra.mxu0 %v2641_v4 }
 0x288   :  { %2661 = vmatprep.subr.bf16.mxu0 %v2791_v16 }
 0x28a   :  { %2517 = vmatmul.mubr.f32.vlgmr.msra.gmra.mrb[8].mxu0 %v1667_v47 }
 0x28b   :  { %2663 = vmatpush3.bf16.msra.mxu0 %v2662_v7  ;;  %2527 = vmatprep.mubr.msk.f32.mxu0 %vm2792_vm3, %v2793_v15 }
 0x28c   :  { %2664 = vmatprep.subr.bf16.mxu0 %v2791_v16 }
 0x28f   :  { %2666 = vmatpush3.bf16.msra.mxu0 %v2665_v23 }
 0x290   :  { %2667 = vmatprep.subr.bf16.mxu0 %v2791_v16 }
 0x292   :  { %2528 = vmatmul.mubr.f32.vlgmr.msra.gmra.mrb[8].mxu0 %v3178_v37 }
 0x293   :  { %2669 = vmatpush3.bf16.msra.mxu0 %v2638_v53  ;;  %2538 = vmatprep.mubr.msk.f32.mxu0 %vm2792_vm3, %v2793_v15 }
 0x294   :  { %2670 = vmatprep.subr.bf16.mxu0 %v2791_v16 }
 0x297   :  { %2672 = vmatpush3.bf16.msra.mxu0 %v2641_v4 }
 0x29a   :  { %2539 = vmatmul.mubr.f32.vlgmr.msra.gmra.mrb[8].mxu0 %v3178_v37 }
 0x345   :  { %v1671_v29 = vpop.f32.mrb[12].mxu1 }
 0x346   :  { %v2485_v26 = vpop.f32.mrb[13].mxu1  ;;  %v1672_v34 = vadd.f32 %v1671_v29, %v1591_v1 }
 0x36d   :  { %v2077_v35 = vpop.f32.mrb[8].mxu0 }
 0x36e   :  { %v2694_v38 = vadd.f32 %v2077_v35, %v1672_v34  ;;  %v2540_v39 = vpop.f32.mrb[9].mxu0 }
 0x370   :  { %v2102_v18 = vmul.f32 -1.442695, %v2694_v38 }
 0x372   :  { %2762 = vpow2.f32 %v2102_v18 }
 0x37c   :  { %v2763_v36 = vpop.eup %2762 }
 0x37d   :  { %v2084_v15 = vadd.f32 1.0, %v2763_v36 }
 0x37f   :  { %2764 = vrcp.f32 %v2084_v15 }
 0x389   :  { %v2765_v16 = vpop.eup %2764 }
 0x38a   :  { %2087 = vst [vmem:[#allocation3] sm:$0x1] %v2765_v16 }
 0x38b   :  { %2777 = shalt.err (!%p2774_p4)
}
 0x38c   :  { %s2778_s28 = scalar_lea.hbm %s3226_s7, 16 }
 0x38d   :  { %p2779_p5 = scmp.ne.s32.totalorder %s3226_s7, %s2778_s28  ;;  %p2782_p6 = scmp.lt.u32.totalorder %s2778_s28, %s3226_s7 }
 0x38f   :  { %p2784_p7 = pnand %p2782_p6, %p2779_p5 }
 0x391   :  { %2787 = shalt.err (!%p2784_p7)
}
 0x392   :  { %2097 = dma.vmem_to_hbm [thread:$0]  %s2095_s23, 16, %s3226_s7, [#allocation4]  }
 0x393   :  { %2788 = dma.done.wait [#allocation4], 16  }
 0x394   :  { %2789 = vsyncadd [#allocation4], 4294967280 }
 0x395   :  { %2101 = vsyncpa [#allocation4], 1 }

</bundles_post_ra>
